<compile_context>
chip_gen: v7x
topology: tpu7x:2x2x1
jax: 0.10.0
libtpu: 0.0.40
codegen_flags: <defaults>
</compile_context>

<pallas_src>
import jax
import jax.numpy as jnp
import numpy as np
from jax.experimental import pallas as pl
from jax.experimental.pallas import tpu as pltpu

_LANE = 128          # TPU lane width (last-dim vector width)
_GRIDLESS_MAX = 1024 # below/at this batch, whole problem resident (no grid)
_TM_MIN = 1024       # min batch tile (amortizes ~0.35us/step pipeline overhead)
_TM_MAX = 4096       # max batch tile (keeps VMEM ~26 MB, safe on v7x 64 MiB)
_TM_GRANULE = 512


def _round_up(x, m):
    return -(-int(x) // m) * m


def make_mlp_kernel(n_inputs):
    """Fused 2-layer MLP kernel for `n_inputs` (to-be-concatenated) inputs."""

    def kernel(*refs):
        x_refs = refs[:n_inputs]
        w1_refs = refs[n_inputs:2 * n_inputs]
        b1_ref, w2_ref, b2_ref, o_ref = refs[2 * n_inputs:]

        # Hidden layer: sum_i x_i @ W1_i == concat(x_i, -1) @ W1 (concat fused).
        # Operands stay in their native dtype (bf16-friendly), accumulate in f32.
        # TODO(synk): if n_inputs grows beyond ~3, switch to a single K=sum(d_i)
        # dot over a copied-in (tm, sum(d_i)) scratch tile instead of a sum of dots.
        acc = jnp.dot(x_refs[0][...], w1_refs[0][...],
                      preferred_element_type=jnp.float32)
        for x_r, w_r in zip(x_refs[1:], w1_refs[1:]):
            acc = acc + jnp.dot(x_r[...], w_r[...],
                                preferred_element_type=jnp.float32)

        h = jnp.maximum(acc + b1_ref[...], 0.0)   # f32 bias + ReLU (VPU; v5e-safe)
        # TODO(synk): Dropout with p>0 (training mode) is not implemented; it
        # would need pltpu.prng_seed/prng_random_bits.  p=0.0 (module default)
        # makes it the identity.

        # Output layer: cast hidden back to the weight dtype (no-op for f32) so
        # bf16 weights give a bf16 MXU pass; accumulate in f32.
        y = jnp.dot(h.astype(w2_ref.dtype), w2_ref[...],
                    preferred_element_type=jnp.float32)
        o_ref[...] = (y + b2_ref[...]).astype(o_ref.dtype)

    return kernel


def prepare_params(w1, b1, w2, b2, input_dims):
    """One-time host-side parameter prep.

    * The hidden dim is zero-padded to a multiple of 128 lanes (extra W1
      columns / b1 entries / W2 rows are zero, so the output is unchanged):
      lane-dense hidden activation and a full-width second MXU pass.
    * w1 ([D_in, H], already transposed vs torch.nn.Linear.weight) is split per
      input tensor so the concat can be fused inside the kernel.
    * Biases are stored as f32 [1, *] rows (v5e-safe VPU math, broadcast-ready).
    * The output dim is NOT padded: the kernel emits (B, d_out) directly.
    """
    input_dims = tuple(int(d) for d in input_dims)
    w1 = jnp.asarray(w1)
    w2 = jnp.asarray(w2)
    H = int(w1.shape[1])
    d_out = int(w2.shape[1])
    h_pad = max(_LANE, _round_up(H, _LANE))

    w1_p = jnp.zeros((w1.shape[0], h_pad), w1.dtype).at[:, :H].set(w1)
    w2_p = jnp.zeros((h_pad, d_out), w2.dtype).at[:H, :].set(w2)
    b1_p = jnp.zeros((1, h_pad), jnp.float32).at[0, :H].set(
        jnp.asarray(b1, jnp.float32).reshape(-1))
    b2_p = jnp.asarray(b2, jnp.float32).reshape(1, -1)

    splits = np.cumsum(input_dims)[:-1].tolist()
    w1_parts = [jnp.asarray(p) for p in jnp.split(w1_p, splits, axis=0)]
    return w1_parts, b1_p, w2_p, b2_p


def _pick_tile(B):
    """Batch tile for the gridded path: >=2-4 grid steps when B is large (v7x:
    both TensorCores get work), tiles >=1024 rows (step-overhead amortized),
    capped at 4096 (VMEM headroom on v7x's 64 MiB)."""
    tm = _round_up(pl.cdiv(B, 4), _TM_GRANULE)
    return int(max(_TM_MIN, min(_TM_MAX, tm)))


def _vmem_limit_bytes(tm, d_ins, h_pad, d_out, act_isz, w_isz):
    """Explicit scoped-VMEM budget with headroom.  VMEM pads the lane (last)
    dim of every buffer to 128, so narrow columns are accounted at 128 lanes."""
    lp = lambda d: _round_up(d, _LANE)
    streamed = 2 * tm * (sum(lp(d) for d in d_ins) + lp(d_out)) * act_isz  # 2-deep x/out tiles
    resident = 2 * (sum(lp(h_pad) * _round_up(d, 8) for d in d_ins)        # W1_i (2 bufs worst case)
                    + lp(d_out) * h_pad                                    # W2
                    + (lp(h_pad) + lp(d_out)) * 8) * w_isz                 # b1 / b2 rows
    interm = 3 * tm * lp(h_pad) * 4                                        # f32 acc / h / y live values
    return max(int(1.25 * (streamed + resident + interm)) + (2 << 20), 16 << 20)


@jax.jit
def mlp_forward(inputs, w1_parts, b1, w2, b2):
    """inputs: list of [B, d_i]; w1_parts: list of [d_i, H_pad]; b1: [1, H_pad] f32;
    w2: [H_pad, d_out]; b2: [1, d_out] f32.  Returns [B, d_out]."""
    n_in = len(inputs)
    B = int(inputs[0].shape[0])
    h_pad = int(w1_parts[0].shape[1])
    d_ins = [int(x.shape[1]) for x in inputs]
    d_out = int(w2.shape[1])
    out_dtype = inputs[0].dtype
    kernel = make_mlp_kernel(n_in)

    act_isz = np.dtype(out_dtype).itemsize
    w_isz = np.dtype(w2.dtype).itemsize
    cost = pl.CostEstimate(
        flops=2 * B * (sum(d_ins) * h_pad + h_pad * d_out),
        transcendentals=0,
        bytes_accessed=(B * (sum(d_ins) + d_out) * act_isz
                        + (sum(d_ins) * h_pad + h_pad * d_out) * w_isz
                        + (h_pad + d_out) * 4),
    )
    args = (*inputs, *w1_parts, b1, w2, b2)
    out_shape = jax.ShapeDtypeStruct((B, d_out), out_dtype)

    if B <= _GRIDLESS_MAX:
        # Single block: everything fits in VMEM.  No grid -> no grid-step /
        # pipeline prologue overhead, and no extra slice op afterwards, for
        # this latency-bound size.  Explicit VMEM limit (v5e default is 16 MiB).
        vmem = pl.BlockSpec(memory_space=pltpu.MemorySpace.VMEM)
        return pl.pallas_call(
            kernel,
            out_shape=out_shape,
            in_specs=[vmem] * len(args),
            out_specs=vmem,
            compiler_params=pltpu.CompilerParams(
                vmem_limit_bytes=_vmem_limit_bytes(B, d_ins, h_pad, d_out,
                                                   act_isz, w_isz)),
            cost_estimate=cost,
        )(*args)

    # Batch-tiled: stream (tm, *) activation/output tiles; weights & biases
    # stay resident across grid steps (constant index_map => no re-DMA).
    # If B % tm != 0, the last step computes on padded/garbage rows and Pallas
    # masks the out-of-range writeback (correct, but the last step still pays
    # full-tm compute).
    tm = _pick_tile(B)
    in_specs = (
        [pl.BlockSpec((tm, d), lambda i: (i, 0)) for d in d_ins]         # x_i tiles
        + [pl.BlockSpec((d, h_pad), lambda i: (0, 0)) for d in d_ins]    # W1_i resident
        + [pl.BlockSpec((1, h_pad), lambda i: (0, 0)),                   # b1 resident
           pl.BlockSpec((h_pad, d_out), lambda i: (0, 0)),               # W2 resident
           pl.BlockSpec((1, d_out), lambda i: (0, 0))]                   # b2 resident
    )
    return pl.pallas_call(
        kernel,
        out_shape=out_shape,
        grid=(pl.cdiv(B, tm),),
        in_specs=in_specs,
        out_specs=pl.BlockSpec((tm, d_out), lambda i: (i, 0)),
        compiler_params=pltpu.CompilerParams(
            dimension_semantics=("parallel",),   # v7x: shard grid steps over both TCs
            vmem_limit_bytes=_vmem_limit_bytes(tm, d_ins, h_pad, d_out,
                                               act_isz, w_isz),
        ),
        cost_estimate=cost,
    )(*args)


def init_params(key, d_in, hidden, d_out, dtype=jnp.float32):
    """Deterministic synthetic params (PyTorch-style uniform fan-in init),
    stored transposed vs torch.nn.Linear.weight (i.e. [in, out])."""
    k1, k2, k3, k4 = jax.random.split(key, 4)
    lim1 = 1.0 / np.sqrt(d_in)
    lim2 = 1.0 / np.sqrt(hidden)
    w1 = jax.random.uniform(k1, (d_in, hidden), dtype, -lim1, lim1)
    b1 = jax.random.uniform(k2, (hidden,), dtype, -lim1, lim1)
    w2 = jax.random.uniform(k3, (hidden, d_out), dtype, -lim2, lim2)
    b2 = jax.random.uniform(k4, (d_out,), dtype, -lim2, lim2)
    return w1, b1, w2, b2


if __name__ == "__main__":
    # MLPNet(input_dims=(16, 16), output_dim=8, hidden_layer_sizes=(64,)).
    B = 8
    input_dims = (16, 16)
    D_in = int(np.sum(input_dims))
    HIDDEN = 64
    D_out = 8

    key = jax.random.PRNGKey(0)
    k_x1, k_x2, k_p = jax.random.split(key, 3)
    x1 = jax.random.normal(k_x1, (B, input_dims[0]), jnp.float32)
    x2 = jax.random.normal(k_x2, (B, input_dims[1]), jnp.float32)

    w1, b1, w2, b2 = init_params(k_p, D_in, HIDDEN, D_out)
    w1_parts, b1_p, w2_p, b2_p = prepare_params(w1, b1, w2, b2, input_dims)

    # Small batch: grid-less single-block path (output written at true d_out).
    out = jax.block_until_ready(
        mlp_forward([x1, x2], w1_parts, b1_p, w2_p, b2_p))

    x_cat = jnp.concatenate([x1, x2], axis=-1)
    ref = jnp.maximum(x_cat @ w1 + b1, 0.0) @ w2 + b2
    np.testing.assert_allclose(np.asarray(out), np.asarray(ref),
                               rtol=1e-5, atol=1e-5)

    # Large batch: exercises the batch-tiled (resident-weight, parallel) path,
    # including a batch that is not a multiple of the tile (masked last step).
    BB = 2048 + 24   # tm = 1024 -> 3 grid steps, last one partial
    kb1, kb2 = jax.random.split(jax.random.PRNGKey(1), 2)
    xb1 = jax.random.normal(kb1, (BB, input_dims[0]), jnp.float32)
    xb2 = jax.random.normal(kb2, (BB, input_dims[1]), jnp.float32)
    out_b = jax.block_until_ready(
        mlp_forward([xb1, xb2], w1_parts, b1_p, w2_p, b2_p))
    xb_cat = jnp.concatenate([xb1, xb2], axis=-1)
    ref_b = jnp.maximum(xb_cat @ w1 + b1, 0.0) @ w2 + b2
    np.testing.assert_allclose(np.asarray(out_b), np.asarray(ref_b),
                               rtol=1e-4, atol=1e-4)

    print("KERNEL_OK")
</pallas_src>

<mosaic_0001>
module attributes {stable_mosaic.version = 11 : i64} {
  func.func @kernel(%arg0: memref<8x16xf32, #tpu.memory_space<vmem>>, %arg1: memref<8x16xf32, #tpu.memory_space<vmem>>, %arg2: memref<16x128xf32, #tpu.memory_space<vmem>>, %arg3: memref<16x128xf32, #tpu.memory_space<vmem>>, %arg4: memref<1x128xf32, #tpu.memory_space<vmem>>, %arg5: memref<128x8xf32, #tpu.memory_space<vmem>>, %arg6: memref<1x8xf32, #tpu.memory_space<vmem>>, %arg7: memref<8x8xf32, #tpu.memory_space<vmem>>) attributes {dimension_semantics = [], scalar_prefetch = 0 : i64, scratch_operands = 0 : i64, tpu.core_type = #tpu.core_type<tc>} {
    %c0 = arith.constant 0 : index
    %c0_0 = arith.constant 0 : index
    %0 = vector.load %arg0[%c0, %c0_0] : memref<8x16xf32, #tpu.memory_space<vmem>>, vector<8x16xf32>
    %c0_1 = arith.constant 0 : index
    %c0_2 = arith.constant 0 : index
    %1 = vector.load %arg2[%c0_1, %c0_2] : memref<16x128xf32, #tpu.memory_space<vmem>>, vector<16x128xf32>
    %cst = arith.constant dense<0.000000e+00> : vector<8x128xf32>
    %2 = tpu.matmul %0, %1, %cst {dimension_numbers = #tpu.dot_dimension_numbers<[1], [0], [0], [1], [0, 0, 1, 1], [], []>} : vector<8x16xf32>, vector<16x128xf32>, vector<8x128xf32> -> vector<8x128xf32>
    %c0_3 = arith.constant 0 : index
    %c0_4 = arith.constant 0 : index
    %3 = vector.load %arg1[%c0_3, %c0_4] : memref<8x16xf32, #tpu.memory_space<vmem>>, vector<8x16xf32>
    %c0_5 = arith.constant 0 : index
    %c0_6 = arith.constant 0 : index
    %4 = vector.load %arg3[%c0_5, %c0_6] : memref<16x128xf32, #tpu.memory_space<vmem>>, vector<16x128xf32>
    %cst_7 = arith.constant dense<0.000000e+00> : vector<8x128xf32>
    %5 = tpu.matmul %3, %4, %cst_7 {dimension_numbers = #tpu.dot_dimension_numbers<[1], [0], [0], [1], [0, 0, 1, 1], [], []>} : vector<8x16xf32>, vector<16x128xf32>, vector<8x128xf32> -> vector<8x128xf32>
    %6 = arith.addf %2, %5 : vector<8x128xf32>
    %c0_8 = arith.constant 0 : index
    %c0_9 = arith.constant 0 : index
    %7 = vector.load %arg4[%c0_8, %c0_9] : memref<1x128xf32, #tpu.memory_space<vmem>>, vector<1x128xf32>
    %8 = vector.broadcast %7 : vector<1x128xf32> to vector<8x128xf32>
    %9 = arith.addf %6, %8 : vector<8x128xf32>
    %cst_10 = arith.constant 0.000000e+00 : f32
    %10 = vector.broadcast %cst_10 : f32 to vector<8x128xf32>
    %11 = arith.maximumf %9, %10 : vector<8x128xf32>
    %c0_11 = arith.constant 0 : index
    %c0_12 = arith.constant 0 : index
    %12 = vector.load %arg5[%c0_11, %c0_12] : memref<128x8xf32, #tpu.memory_space<vmem>>, vector<128x8xf32>
    %cst_13 = arith.constant dense<0.000000e+00> : vector<8x8xf32>
    %13 = tpu.matmul %11, %12, %cst_13 {dimension_numbers = #tpu.dot_dimension_numbers<[1], [0], [0], [1], [0, 0, 1, 1], [], []>} : vector<8x128xf32>, vector<128x8xf32>, vector<8x8xf32> -> vector<8x8xf32>
    %c0_14 = arith.constant 0 : index
    %c0_15 = arith.constant 0 : index
    %14 = vector.load %arg6[%c0_14, %c0_15] : memref<1x8xf32, #tpu.memory_space<vmem>>, vector<1x8xf32>
    %15 = vector.broadcast %14 : vector<1x8xf32> to vector<8x8xf32>
    %16 = arith.addf %13, %15 : vector<8x8xf32>
    %c0_16 = arith.constant 0 : index
    %c0_17 = arith.constant 0 : index
    %17 = vector.load %arg7[%c0_16, %c0_17] : memref<8x8xf32, #tpu.memory_space<vmem>>, vector<8x8xf32>
    tpu.vector_store %arg7[%c0_16, %c0_17], %16 {strides = array<i32>} : memref<8x8xf32, #tpu.memory_space<vmem>>, vector<8x8xf32>,
    return
  }
}

</mosaic_0001>

<bundles_post_ra>
// kernel: mlp_forward.1
= control target key start
LH: loop header
LB: loop body
LE: loop exit
PB: predicated region body
PF: predicated region fallthrough
CT: control target
= control target key end

     0   :  { %v432_v2 = vmov 0.0|0.0   ;;  %vm433_vm0 = vmmov 0   ;;  %v434_v4 = vmov 0.0   ;;  %vm33_vm1 = vcmask 130048   ;;  %s565_s0 = inlined_call_operand.vmem [shape: f32[8,16], index: 0, kind: input, shape index: {}]   ;;  %s566_s1 = inlined_call_operand.vmem [shape: f32[8,16], index: 1, kind: input, shape index: {}]   ;;  %s567_s2 = inlined_call_operand.vmem [shape: f32[16,128], index: 2, kind: input, shape index: {}]   ;;  %s568_s3 = inlined_call_operand.vmem [shape: f32[16,128], index: 3, kind: input, shape index: {}]   ;;  %s569_s4 = inlined_call_operand.vmem [shape: f32[1,128], index: 4, kind: input, shape index: {}]   ;;  %s570_s5 = inlined_call_operand.vmem [shape: f32[128,8], index: 5, kind: input, shape index: {}]   ;;  %s571_s6 = inlined_call_operand.vmem [shape: f32[1,8], index: 6, kind: input, shape index: {}]   ;;  %s572_s7 = inlined_call_operand.hbm [shape: f32[8,8], index: 7, kind: output, shape index: {}]  }
   0x1   :  { %v31_v0 = vld [vmem:[%s568_s3] sm:$0xff]  ;;  %v32_v1 = vld [vmem:[%s568_s3 + $0x8] sm:$0xff]  ;;  %374 = vmatprep.subr.bf16.mxu1 %v432_v2  ;;  %329 = vmatprep.mubr.msk.f32.mxu1 %vm433_vm0, %v434_v4  ;;  %v191_v9 = vld [vmem:[%s570_s5 + $0x10] sm:$0xff] }
   0x2   :  { %v375_v3 = vpack.c.bf16 %v32_v1, %v31_v0  ;;  %v28_v5 = vld [vmem:[%s567_s2] sm:$0xff]  ;;  %v29_v6 = vld [vmem:[%s567_s2 + $0x8] sm:$0xff]  ;;  %380 = vmatprep.subr.bf16.mxu0 %v432_v2  ;;  %371 = vmatprep.mubr.msk.f32.mxu0 %vm433_vm0, %v434_v4  ;;  %v192_v13 = vld [vmem:[%s570_s5 + $0x18] sm:$0xff] }
   0x3   :  { %v189_v7 = vld [vmem:[%s570_s5] sm:$0xff]  ;;  %v190_v8 = vld [vmem:[%s570_s5 + $0x8] sm:$0xff]  ;;  %v378_v11 = vpack.c.bf16 %v29_v6, %v28_v5  ;;  %v384_v14 = vpack.c.bf16 %v192_v13, %v191_v9 }
   0x4   :  { %376 = vmatpush3.bf16.msra.mxu1 %v375_v3  ;;  %v30_v10 = vld [vmem:[%s566_s1] sm:$0xff]  ;;  %v381_v12 = vpack.c.bf16 %v190_v8, %v189_v7 }
   0x5   :  { %377 = vmatprep.subr.bf16.mxu1 %v432_v2 }
   0x6   :  { %382 = vmatpush3.bf16.msra.mxu0 %v381_v12 }
   0x7   :  { %12 = vsyncpa [#allocation3], 0  ;;  %330 = vmatmul.mubr.msk.f32.vlgmr.msra.gmra.mrb[0].mxu1 %vm33_vm1, %v30_v10  ;;  %383 = vmatprep.subr.bf16.mxu0 %v432_v2  ;;  %v193_v15 = vld [vmem:[%s570_s5 + $0x20] sm:$0xff]  ;;  %v194_v16 = vld [vmem:[%s570_s5 + $0x28] sm:$0xff]  ;;  %s435_s1 = smov [#allocation2]   ;;  %vm282_vm2 = vcmask 64512  }
   0x8   :  { %379 = vmatpush3.bf16.msra.mxu1 %v378_v11  ;;  %336 = vmatprep.mubr.msk.f32.mxu1 %vm433_vm0, %v434_v4  ;;  %v27_v17 = vld [vmem:[%s565_s0] sm:$0xff]  ;;  %v387_v18 = vpack.c.bf16 %v194_v16, %v193_v15  ;;  %v195_v19 = vld [vmem:[%s570_s5 + $0x30] sm:$0xff]  ;;  %v196_v20 = vld [vmem:[%s570_s5 + $0x38] sm:$0xff] }
   0x9   :  { %v390_v21 = vpack.c.bf16 %v196_v20, %v195_v19  ;;  %v197_v22 = vld [vmem:[%s570_s5 + $0x40] sm:$0xff]  ;;  %v198_v23 = vld [vmem:[%s570_s5 + $0x48] sm:$0xff]  ;;  %v199_v25 = vld [vmem:[%s570_s5 + $0x50] sm:$0xff] }
   0xa   :  { %385 = vmatpush3.bf16.msra.mxu0 %v384_v14  ;;  %v393_v24 = vpack.c.bf16 %v198_v23, %v197_v22  ;;  %v200_v26 = vld [vmem:[%s570_s5 + $0x58] sm:$0xff]  ;;  %v201_v28 = vld [vmem:[%s570_s5 + $0x60] sm:$0xff]  ;;  %v202_v29 = vld [vmem:[%s570_s5 + $0x68] sm:$0xff] }
   0xb   :  { %337 = vmatmul.mubr.msk.f32.vlgmr.msra.gmra.mrb[2].mxu1 %vm33_vm1, %v27_v17  ;;  %386 = vmatprep.subr.bf16.mxu0 %v432_v2  ;;  %v396_v27 = vpack.c.bf16 %v200_v26, %v199_v25  ;;  %v399_v30 = vpack.c.bf16 %v202_v29, %v201_v28  ;;  %v203_v31 = vld [vmem:[%s570_s5 + $0x70] sm:$0xff]  ;;  %v204_v32 = vld [vmem:[%s570_s5 + $0x78] sm:$0xff]  ;;  %v300_v37 = vld [vmem:[%s569_s4] ss:$0 sm:$0xff]  ;;  %s290_s5 = sshll.u32 %s435_s1, 4  ;;  %s291_s5 = int_to_ptr.vmem [resolvable:$true] %s290_s5 }
   0xc   :  { %v402_v33 = vpack.c.bf16 %v204_v32, %v203_v31  ;;  %v301_v42 = vld [vmem:[%s571_s6] ss:$0 sm:$0xff]  ;;  %s408_s20 = scalar_lea.vmem %s291_s5, 128  ;;  %p413_p1 = scmp.lt.s32.totalorder %s291_s5, %s291_s5 }
   0xd   :  { %p409_p0 = scmp.ne.s32.totalorder %s291_s5, %s408_s20  ;;  %p414_p2 = scmp.lt.s32.totalorder %s408_s20, %s408_s20 }
   0xe   :  { %388 = vmatpush3.bf16.msra.mxu0 %v387_v18 }
   0xf   :  { %389 = vmatprep.subr.bf16.mxu0 %v432_v2  ;;  %p415_p3 = por %p414_p2, %p413_p1 }
  0x11   :  { %p416_p4 = pnand %p415_p3, %p409_p0 }
  0x12   :  { %391 = vmatpush3.bf16.msra.mxu0 %v390_v21 }
  0x13   :  { %392 = vmatprep.subr.bf16.mxu0 %v432_v2 }
  0x16   :  { %394 = vmatpush3.bf16.msra.mxu0 %v393_v24 }
  0x17   :  { %395 = vmatprep.subr.bf16.mxu0 %v432_v2 }
  0x1a   :  { %397 = vmatpush3.bf16.msra.mxu0 %v396_v27 }
  0x1b   :  { %398 = vmatprep.subr.bf16.mxu0 %v432_v2 }
  0x1e   :  { %400 = vmatpush3.bf16.msra.mxu0 %v399_v30 }
  0x1f   :  { %401 = vmatprep.subr.bf16.mxu0 %v432_v2 }
  0x22   :  { %403 = vmatpush3.bf16.msra.mxu0 %v402_v33 }
  0xda   :  { %v103_v34 = vpop.f32.mrb[0].mxu1 }
  0xdb   :  { %v331_v35 = vpop.f32.mrb[1].mxu1 }
  0xde   :  { %v176_v36 = vpop.f32.mrb[2].mxu1 }
  0xdf   :  { %v177_v38 = vadd.f32 %v176_v36, %v103_v34  ;;  %v338_v39 = vpop.f32.mrb[3].mxu1 }
  0xe1   :  { %v187_v40 = vadd.f32 %v300_v37, %v177_v38 }
  0xe3   :  { %v188_v41 = vmax.f32 %v187_v40, 0.0 }
  0xe5   :  { %372 = vmatmul.mubr.f32.vlgmr.msra.gmra.mrb[0].mxu0 %v188_v41 }
 0x1b8   :  { %v278_v43 = vpop.f32.mrb[0].mxu0 }
 0x1b9   :  { %v279_v44 = vadd.f32 %v301_v42, %v278_v43  ;;  %v373_v45 = vpop.f32.mrb[1].mxu0 }
 0x1bb   :  { %283 = vst.msk [vmem:[#allocation2] sm:$0xff] %vm282_vm2, %v279_v44 }
 0x1bc   :  { %419 = shalt.err (!%p416_p4)
}
 0x1bd   :  { %s420_s22 = scalar_lea.hbm %s572_s7, 128 }
 0x1be   :  { %p421_p5 = scmp.ne.s32.totalorder %s572_s7, %s420_s22  ;;  %p424_p6 = scmp.lt.u32.totalorder %s420_s22, %s572_s7 }
 0x1c0   :  { %p426_p7 = pnand %p424_p6, %p421_p5 }
 0x1c2   :  { %429 = shalt.err (!%p426_p7)
}
 0x1c3   :  { %293 = dma.vmem_to_hbm [thread:$0]  %s291_s5, 128, %s572_s7, [#allocation3]  }
 0x1c4   :  { %430 = dma.done.wait [#allocation3], 128  }
 0x1c5   :  { %431 = vsyncadd [#allocation3], 4294967168 }
 0x1c6   :  { %297 = vsyncpa [#allocation3], 1 }

</bundles_post_ra>
